<compile_context>
chip_gen: v7x
topology: tpu7x:2x2x1
jax: 0.10.0
libtpu: 0.0.40
codegen_flags: <defaults>
</compile_context>

<pallas_src>
import jax
import jax.numpy as jnp
from jax.experimental import pallas as pl
from jax.experimental.pallas import tpu as pltpu


def se_block_kernel(x_ref, w1t_ref, w2t_ref, o_ref):
    # x_ref: (Bb, C, HW)   w1t_ref: (C, Cr) f32   w2t_ref: (Cr, C) f32
    x = x_ref[...]                                                   # native dtype

    # Global average pool over the spatial (lane) axis; accumulate in f32.
    pooled = jnp.mean(x.astype(jnp.float32), axis=-1)                # (Bb, C)

    # Batched FC1 -> ReLU -> FC2 -> Sigmoid (f32 accumulation on the MXU).
    h = jnp.maximum(
        jnp.dot(pooled, w1t_ref[...], preferred_element_type=jnp.float32),
        0.0)                                                         # (Bb, Cr)
    s = jax.nn.sigmoid(
        jnp.dot(h, w2t_ref[...], preferred_element_type=jnp.float32))  # (Bb, C)

    # Broadcast scale over HW in the input's native dtype.
    o_ref[...] = (x * s.astype(x.dtype)[:, :, None]).astype(o_ref.dtype)


def se_block(x, w1, w2, *, max_vmem_tile_bytes=8 * 1024 * 1024):
    """x: (B, C, H, W) NCHW.  w1: (C//r, C), w2: (C, C//r).  Returns (B, C, H, W)."""
    B, C, H, W = x.shape
    HW = H * W
    Cr = w1.shape[0]

    x_flat = x.reshape(B, C, HW)
    # Pre-transpose + pre-cast weights once in the wrapper (tiny, resident tiles).
    w1t = jnp.transpose(w1).astype(jnp.float32)   # (C, Cr)
    w2t = jnp.transpose(w2).astype(jnp.float32)   # (Cr, C)

    # Bytes per batch element per grid step, counting Pallas double-buffering
    # of both the input tile and the output tile.
    bytes_per_batch = 4 * C * HW * x.dtype.itemsize
    Bb = max(1, min(B, max_vmem_tile_bytes // max(bytes_per_batch, 1)))
    while B % Bb != 0:
        Bb -= 1
    grid = (B // Bb,)

    cost = pl.CostEstimate(
        flops=2 * B * C * HW + 4 * B * C * Cr,           # pool + scale + 2 FCs
        transcendentals=B * C,                           # sigmoid exps
        bytes_accessed=2 * B * C * HW * x.dtype.itemsize
        + 2 * C * Cr * 4,
    )

    out_flat = pl.pallas_call(
        se_block_kernel,
        out_shape=jax.ShapeDtypeStruct((B, C, HW), x.dtype),
        grid=grid,
        in_specs=[
            pl.BlockSpec((Bb, C, HW), lambda b: (b, 0, 0)),   # batch tile
            pl.BlockSpec((C, Cr), lambda b: (0, 0)),          # fc1 weight (resident)
            pl.BlockSpec((Cr, C), lambda b: (0, 0)),          # fc2 weight (resident)
        ],
        out_specs=pl.BlockSpec((Bb, C, HW), lambda b: (b, 0, 0)),
        compiler_params=pltpu.CompilerParams(
            dimension_semantics=("parallel",),
        ),
        cost_estimate=cost,
    )(x_flat, w1t, w2t)

    return out_flat.reshape(B, C, H, W)


def se_block_reference(x, w1, w2):
    """Pure-JAX reference mirroring the PyTorch forward."""
    y = jnp.mean(x.astype(jnp.float32), axis=(2, 3))             # (B, C)
    y = jnp.maximum(y @ w1.astype(jnp.float32).T, 0.0)           # (B, C//r)
    y = jax.nn.sigmoid(y @ w2.astype(jnp.float32).T)             # (B, C)
    return (x.astype(jnp.float32) * y[:, :, None, None]).astype(x.dtype)


if __name__ == "__main__":
    B, C, H, W = 2, 32, 16, 16
    reduction = 16
    Cr = C // reduction

    key = jax.random.PRNGKey(0)
    kx, k1, k2 = jax.random.split(key, 3)

    x = jax.random.normal(kx, (B, C, H, W), dtype=jnp.float32)
    # nn.Linear weight shapes: (out_features, in_features)
    w1 = jax.random.normal(k1, (Cr, C), dtype=jnp.float32) * 0.1
    w2 = jax.random.normal(k2, (C, Cr), dtype=jnp.float32) * 0.1

    out = se_block(x, w1, w2)
    out = jax.block_until_ready(out)

    ref = se_block_reference(x, w1, w2)
    assert out.shape == (B, C, H, W)
    assert jnp.allclose(out, ref, atol=1e-5, rtol=1e-5), "mismatch vs reference"

    print("KERNEL_OK")
</pallas_src>

<mosaic_0001>
module attributes {stable_mosaic.version = 11 : i64} {
  func.func @se_block_kernel(%arg0: i32, %arg1: memref<2x32x256xf32, #tpu.memory_space<vmem>>, %arg2: memref<32x2xf32, #tpu.memory_space<vmem>>, %arg3: memref<2x32xf32, #tpu.memory_space<vmem>>, %arg4: memref<2x32x256xf32, #tpu.memory_space<vmem>>) attributes {dimension_semantics = [#tpu.dimension_semantics<parallel>], iteration_bounds = array<i64: 1>, scalar_prefetch = 0 : i64, scratch_operands = 0 : i64, tpu.core_type = #tpu.core_type<tc>, window_params = [{transform_indices = @transform_0, window_bounds = array<i64: 2, 32, 256>}, {pipeline_mode = #tpu.pipeline_mode<synchronous>, transform_indices = @transform_1, window_bounds = array<i64: 32, 2>}, {pipeline_mode = #tpu.pipeline_mode<synchronous>, transform_indices = @transform_2, window_bounds = array<i64: 2, 32>}, {transform_indices = @transform_3, window_bounds = array<i64: 2, 32, 256>}]} {
    %c0 = arith.constant 0 : index
    %c0_0 = arith.constant 0 : index
    %c0_1 = arith.constant 0 : index
    %0 = vector.load %arg1[%c0, %c0_0, %c0_1] : memref<2x32x256xf32, #tpu.memory_space<vmem>>, vector<2x32x256xf32>
    %cst = arith.constant dense<0.000000e+00> : vector<2x32xf32>
    %1 = vector.multi_reduction <add>, %0, %cst [2] : vector<2x32x256xf32> to vector<2x32xf32>
    %cst_2 = arith.constant 2.560000e+02 : f32
    %2 = vector.broadcast %cst_2 : f32 to vector<2x32xf32>
    %3 = arith.divf %1, %2 : vector<2x32xf32>
    %c0_3 = arith.constant 0 : index
    %c0_4 = arith.constant 0 : index
    %4 = vector.load %arg2[%c0_3, %c0_4] : memref<32x2xf32, #tpu.memory_space<vmem>>, vector<32x2xf32>
    %cst_5 = arith.constant dense<0.000000e+00> : vector<2x2xf32>
    %5 = tpu.matmul %3, %4, %cst_5 {dimension_numbers = #tpu.dot_dimension_numbers<[1], [0], [0], [1], [0, 0, 1, 1], [], []>} : vector<2x32xf32>, vector<32x2xf32>, vector<2x2xf32> -> vector<2x2xf32>
    %cst_6 = arith.constant 0.000000e+00 : f32
    %6 = vector.broadcast %cst_6 : f32 to vector<2x2xf32>
    %7 = arith.maximumf %5, %6 : vector<2x2xf32>
    %c0_7 = arith.constant 0 : index
    %c0_8 = arith.constant 0 : index
    %8 = vector.load %arg3[%c0_7, %c0_8] : memref<2x32xf32, #tpu.memory_space<vmem>>, vector<2x32xf32>
    %cst_9 = arith.constant dense<0.000000e+00> : vector<2x32xf32>
    %9 = tpu.matmul %7, %8, %cst_9 {dimension_numbers = #tpu.dot_dimension_numbers<[1], [0], [0], [1], [0, 0, 1, 1], [], []>} : vector<2x2xf32>, vector<2x32xf32>, vector<2x32xf32> -> vector<2x32xf32>
    %10 = arith.negf %9 : vector<2x32xf32>
    %11 = math.exp %10 : vector<2x32xf32>
    %cst_10 = arith.constant 1.000000e+00 : f32
    %12 = vector.broadcast %cst_10 : f32 to vector<2x32xf32>
    %13 = arith.addf %12, %11 : vector<2x32xf32>
    %14 = arith.divf %12, %13 : vector<2x32xf32>
    %15 = vector.shape_cast %14 : vector<2x32xf32> to vector<2x32x1xf32>
    %16 = vector.broadcast %15 : vector<2x32x1xf32> to vector<2x32x256xf32>
    %17 = arith.mulf %0, %16 : vector<2x32x256xf32>
    %c0_11 = arith.constant 0 : index
    %c0_12 = arith.constant 0 : index
    %c0_13 = arith.constant 0 : index
    %18 = vector.load %arg4[%c0_11, %c0_12, %c0_13] : memref<2x32x256xf32, #tpu.memory_space<vmem>>, vector<2x32x256xf32>
    tpu.vector_store %arg4[%c0_11, %c0_12, %c0_13], %17 {strides = array<i32>} : memref<2x32x256xf32, #tpu.memory_space<vmem>>, vector<2x32x256xf32>,
    return
  }
  func.func @transform_0(%arg0: i32) -> (i32, i32, i32) {
    %c0_i32 = arith.constant 0 : i32
    %c0_i32_0 = arith.constant 0 : i32
    %c0_i32_1 = arith.constant 0 : i32
    return %arg0, %c0_i32, %c0_i32_0 : i32, i32, i32
  }
  func.func @transform_1(%arg0: i32) -> (i32, i32) {
    %c0_i32 = arith.constant 0 : i32
    %c0_i32_0 = arith.constant 0 : i32
    %c0_i32_1 = arith.constant 0 : i32
    return %c0_i32, %c0_i32_0 : i32, i32
  }
  func.func @transform_2(%arg0: i32) -> (i32, i32) {
    %c0_i32 = arith.constant 0 : i32
    %c0_i32_0 = arith.constant 0 : i32
    %c0_i32_1 = arith.constant 0 : i32
    return %c0_i32, %c0_i32_0 : i32, i32
  }
  func.func @transform_3(%arg0: i32) -> (i32, i32, i32) {
    %c0_i32 = arith.constant 0 : i32
    %c0_i32_0 = arith.constant 0 : i32
    %c0_i32_1 = arith.constant 0 : i32
    return %arg0, %c0_i32, %c0_i32_0 : i32, i32, i32
  }
}

</mosaic_0001>

<bundles_post_ra>
// kernel: tpu_custom_call.1
= control target key start
LH: loop header
LB: loop body
LE: loop exit
PB: predicated region body
PF: predicated region fallthrough
CT: control target
= control target key end

     0   :  { %8 = vsyncpa [#allocation3], 0  ;;  %s612_s0 = inlined_call_operand.hbm [shape: f32[2,32,256], index: 0, kind: input, shape index: {}]   ;;  %s613_s1 = inlined_call_operand.vmem [shape: f32[32,2], index: 1, kind: input, shape index: {}]   ;;  %s614_s2 = inlined_call_operand.vmem [shape: f32[2,32], index: 2, kind: input, shape index: {}]   ;;  %s615_s3 = inlined_call_operand.hbm [shape: f32[2,32,256], index: 3, kind: output, shape index: {}]  }
   0x1   :  { %9 = vsyncpa [#allocation4], 0  ;;  %s476_s12 = smov [#allocation2]   ;;  %s428_s16 = scalar_lea.hbm %s612_s0, 2048 }
   0x2   :  { %s15_s13 = sshll.u32 %s476_s12, 4  ;;  %p429_p0 = scmp.ne.s32.totalorder %s612_s0, %s428_s16  ;;  %s16_s13 = int_to_ptr.vmem [resolvable:$true] %s15_s13 }
   0x3   :  { %p432_p1 = scmp.lt.u32.totalorder %s428_s16, %s612_s0 }
   0x5   :  { %p434_p2 = pnand %p432_p1, %p429_p0 }
   0x7   :  { %437 = shalt.err (!%p434_p2)
}
   0x8   :  { %s438_s21 = scalar_lea.vmem %s16_s13, 2048  ;;  %p443_p4 = scmp.lt.s32.totalorder %s16_s13, %s16_s13 }
   0x9   :  { %p439_p3 = scmp.ne.s32.totalorder %s16_s13, %s438_s21  ;;  %p444_p5 = scmp.lt.s32.totalorder %s438_s21, %s438_s21 }
   0xb   :  { %p445_p6 = por %p444_p5, %p443_p4 }
   0xd   :  { %p446_p7 = pnand %p445_p6, %p439_p3 }
   0xf   :  { %449 = shalt.err (!%p446_p7)
}
  0x10   :  { %s477_s22 = smov 256   ;;  %s478_s23 = smov 16  }
  0x11   :  { %21 = dma.hbm_to_vmem [thread:$0]  %s612_s0, 2048, %s16_s13, [#allocation3], %s477_s22, %s477_s22, %s478_s23  }
  0x12   :  { %472 = dma.done.wait [#allocation3], 2048  }
  0x13   :  { %473 = vsyncadd [#allocation3], 4294965248  ;;  %v518_v0 = vld [vmem:[#allocation2 + $0x40] sm:$0xff]  ;;  %v520_v1 = vld [vmem:[#allocation2 + $0x48] sm:$0xff]  ;;  %v479_v27 = vmov 0.0|0.0   ;;  %vm480_vm0 = vmmov 0   ;;  %v90_v32 = vlaneseq }
  0x14   :  { %v522_v2 = vld [vmem:[#allocation2] sm:$0xff]  ;;  %v57_v3 = vadd.f32 %v520_v1, %v518_v0  ;;  %v526_v4 = vld [vmem:[#allocation2 + $0x8] sm:$0xff]  ;;  %v528_v5 = vld [vmem:[#allocation2 + $0x50] sm:$0xff]  ;;  %411 = vmatprep.subr.bf16.mxu0 %v479_v27  ;;  %v481_v31 = vmov 0.0   ;;  %vm101_vm1 = vcmask 130112   ;;  %vm108_vm2 = vcmask 195712  }
  0x15   :  { %v530_v6 = vld [vmem:[#allocation2 + $0x58] sm:$0xff]  ;;  %v45_v7 = vadd.f32 %v526_v4, %v522_v2  ;;  %v534_v8 = vld [vmem:[#allocation2 + $0x10] sm:$0xff]  ;;  %v542_v12 = vld [vmem:[#allocation2 + $0x60] sm:$0xff]  ;;  %403 = vmatprep.mubr.msk.f32.mxu0 %vm480_vm0, %v481_v31  ;;  %406 = vmatprep.subr.mxu1 %v481_v31  ;;  %v91_v34 = vand.u32 127, %v90_v32  ;;  %v93_v39 = vshrl.u32 %v90_v32, 7  ;;  %vm115_vm3 = vcmask 261312  }
  0x16   :  { %v536_v9 = vld [vmem:[#allocation2 + $0x18] sm:$0xff]  ;;  %58 = vadd.xlane.f32.xlu1 %v57_v3  ;;  %v60_v10 = vadd.f32 %v530_v6, %v528_v5  ;;  %v544_v13 = vld [vmem:[#allocation2 + $0x68] sm:$0xff]  ;;  %v546_v14 = vld [vmem:[#allocation2 + $0x20] sm:$0xff]  ;;  %408 = vmatprep.mubr.msk.f32.mxu1 %vm480_vm0, %v481_v31  ;;  %vm136_vm4 = vcmask 1041409   ;;  %vm138_vm5 = vcmask 261120   ;;  %vm217_vm6 = vcmask 1041408  }
  0x17   :  { %46 = vadd.xlane.f32.xlu0 %v45_v7  ;;  %v48_v11 = vadd.f32 %v536_v9, %v534_v8  ;;  %v548_v15 = vld [vmem:[#allocation2 + $0x28] sm:$0xff]  ;;  %v63_v16 = vadd.f32 %v544_v13, %v542_v12  ;;  %v554_v18 = vld [vmem:[#allocation2 + $0x70] sm:$0xff]  ;;  %v556_v19 = vld [vmem:[#allocation2 + $0x78] sm:$0xff]  ;;  %v96_v36 = vadd.s32 4294967288, %v91_v34  ;;  %v103_v38 = vadd.s32 4294967280, %v91_v34 }
  0x18   :  { %v51_v17 = vadd.f32 %v548_v15, %v546_v14  ;;  %v558_v20 = vld [vmem:[#allocation2 + $0x30] sm:$0xff]  ;;  %v560_v21 = vld [vmem:[#allocation2 + $0x38] sm:$0xff]  ;;  %v66_v22 = vadd.f32 %v556_v19, %v554_v18  ;;  %v78_v24 = vld [vmem:[%s613_s1] sm:$0xff]  ;;  %v110_v43 = vadd.s32 4294967272, %v91_v34  ;;  %v94_v47 = vsub.s32 %v91_v34, %v93_v39 }
  0x19   :  { %v54_v23 = vadd.f32 %v560_v21, %v558_v20  ;;  %v79_v25 = vld [vmem:[%s613_s1 + $0x8] sm:$0xff]  ;;  %v80_v28 = vld [vmem:[%s613_s1 + $0x10] sm:$0xff]  ;;  %v81_v29 = vld [vmem:[%s613_s1 + $0x18] sm:$0xff]  ;;  %v99_v41 = vsub.s32 %v96_v36, %v93_v39  ;;  %v106_v45 = vsub.s32 %v103_v38, %v93_v39  ;;  %vm213_vm7 = vcmask 15360  }
  0x1a   :  { %61 = vadd.xlane.f32.xlu1 %v60_v10  ;;  %v412_v26 = vpack.c.bf16 %v79_v25, %v78_v24  ;;  %v415_v30 = vpack.c.bf16 %v81_v29, %v80_v28  ;;  %v113_v54 = vsub.s32 %v110_v43, %v93_v39  ;;  %v212_v25 = vld [vmem:[%s614_s2] sm:$0x3]  ;;  %v299_v34 = vsub.s32 0, %v93_v39  ;;  %s482_s2 = smov [#allocation5]  }
  0x1b   :  { %49 = vadd.xlane.f32.xlu0 %v48_v11  ;;  %407 = vmatpush3.msk.msra.mxu1 %vm217_vm6, %v212_v25  ;;  %s372_s7 = sshll.u32 %s482_s2, 4  ;;  %s373_s7 = int_to_ptr.vmem [resolvable:$true] %s372_s7 }
  0x1c   :  { %413 = vmatpush3.bf16.msra.mxu0 %v412_v26  ;;  %s450_s8 = scalar_lea.vmem %s373_s7, 2048  ;;  %p455_p9 = scmp.lt.s32.totalorder %s373_s7, %s373_s7 }
  0x1d   :  { %414 = vmatprep.subr.bf16.mxu0 %v479_v27  ;;  %p451_p8 = scmp.ne.s32.totalorder %s373_s7, %s450_s8  ;;  %p456_p10 = scmp.lt.s32.totalorder %s450_s8, %s450_s8 }
  0x1e   :  { %64 = vadd.xlane.f32.xlu1 %v63_v16 }
  0x1f   :  { %52 = vadd.xlane.f32.xlu0 %v51_v17  ;;  %p457_p11 = por %p456_p10, %p455_p9 }
  0x20   :  { %416 = vmatpush3.bf16.msra.mxu0 %v415_v30 }
  0x21   :  { %p458_p12 = pnand %p457_p11, %p451_p8 }
  0x22   :  { %67 = vadd.xlane.f32.xlu1 %v66_v22 }
  0x23   :  { %55 = vadd.xlane.f32.xlu0 %v54_v23 }
  0xa3   :  { %v59_v33 = vpop.xlane.xlu1 %58 }
  0xa4   :  { %v47_v35 = vpop.xlane.xlu0 %46  ;;  %v74_v48 = vmul.f32 0.00390625, %v59_v33 }
  0xa5   :  { %v70_v51 = vmul.f32 0.00390625, %v47_v35 }
  0xa6   :  { %v120_v58 = vrot.slane %v74_v48, %v94_v47 }
  0xa7   :  { %v62_v37 = vpop.xlane.xlu1 %61  ;;  %v95_v62 = vrot.slane %v70_v51, %v94_v47 }
  0xa8   :  { %v50_v40 = vpop.xlane.xlu0 %49  ;;  %v75_v42 = vmul.f32 0.00390625, %v62_v37  ;;  %v318_v37 = vsub.s32 1, %v93_v39 }
  0xa9   :  { %v71_v44 = vmul.f32 0.00390625, %v50_v40 }
  0xaa   :  { %v124_v53 = vrot.slane %v75_v42, %v99_v41 }
  0xab   :  { %v65_v46 = vpop.xlane.xlu1 %64  ;;  %v100_v55 = vrot.slane %v71_v44, %v99_v41 }
  0xac   :  { %v76_v49 = vmul.f32 0.00390625, %v65_v46  ;;  %v53_v50 = vpop.xlane.xlu0 %52  ;;  %v125_v3 = vsel %vm101_vm1, %v124_v53, %v120_v58 }
  0xad   :  { %v72_v52 = vmul.f32 0.00390625, %v53_v50  ;;  %v102_v10 = vsel %vm101_vm1, %v100_v55, %v95_v62 }
  0xae   :  { %v129_v56 = vrot.slane %v76_v49, %v106_v45 }
  0xaf   :  { %v68_v57 = vpop.xlane.xlu1 %67  ;;  %v107_v59 = vrot.slane %v72_v52, %v106_v45 }
  0xb0   :  { %v77_v60 = vmul.f32 0.00390625, %v68_v57  ;;  %v56_v61 = vpop.xlane.xlu0 %55  ;;  %v130_v11 = vsel %vm108_vm2, %v129_v56, %v125_v3 }
  0xb1   :  { %v73_v63 = vmul.f32 0.00390625, %v56_v61  ;;  %v109_v17 = vsel %vm108_vm2, %v107_v59, %v102_v10 }
  0xb2   :  { %v134_v7 = vrot.slane %v77_v60, %v113_v54 }
  0xb3   :  { %v114_v16 = vrot.slane %v73_v63, %v113_v54 }
  0xb4   :  { %v135_v22 = vsel %vm115_vm3, %v134_v7, %v130_v11 }
  0xb5   :  { %v116_v23 = vsel %vm115_vm3, %v114_v16, %v109_v17 }
  0xb6   :  { %v137_v24 = vsel %vm136_vm4, %v135_v22, %v116_v23 }
  0xb7   :  { %404 = vmatmul.mubr.msk.f32.vlgmr.msra.gmra.mrb[0].mxu0 %vm138_vm5, %v137_v24 }
 0x18a   :  { %v207_v26 = vpop.f32.mrb[0].mxu0 }
 0x18b   :  { %v211_v27 = vmax.f32 %v207_v26, 0.0  ;;  %v405_v28 = vpop.f32.mrb[1].mxu0 }
 0x18d   :  { %409 = vmatmul.mubr.msk.f32.vlgmr.msra.gmra.mrb[0].mxu1 %vm213_vm7, %v211_v27 }
 0x260   :  { %v287_v29 = vpop.f32.mrb[0].mxu1 }
 0x261   :  { %v387_v30 = vmul.f32 -1.442695, %v287_v29  ;;  %v410_v31 = vpop.f32.mrb[1].mxu1 }
 0x263   :  { %424 = vpow2.f32 %v387_v30 }
 0x26d   :  { %v425_v32 = vpop.eup %424 }
 0x26e   :  { %v294_v33 = vadd.f32 1.0, %v425_v32 }
 0x270   :  { %426 = vrcp.f32 %v294_v33 }
 0x27a   :  { %v427_v35 = vpop.eup %426 }
 0x27b   :  { %v300_v36 = vrot.slane %v427_v35, %v299_v34  ;;  %v319_v38 = vrot.slane %v427_v35, %v318_v37 }
 0x27d   :  { %306 = vbcast.lane.b32.xlu1 %v300_v36, 264  ;;  %302 = vbcast.lane.b32.xlu0 %v300_v36, 256 }
 0x281   :  { %310 = vbcast.lane.b32.xlu1 %v300_v36, 272  ;;  %321 = vbcast.lane.b32.xlu0 %v319_v38, 256 }
 0x285   :  { %314 = vbcast.lane.b32.xlu1 %v300_v36, 280  ;;  %329 = vbcast.lane.b32.xlu0 %v319_v38, 272 }
 0x289   :  { %325 = vbcast.lane.b32.xlu1 %v319_v38, 264 }
 0x28d   :  { %333 = vbcast.lane.b32.xlu1 %v319_v38, 280 }
 0x2ef   :  { %v307_v40 = vpop.permute.xlu1 %306  ;;  %v303_v41 = vpop.permute.xlu0 %302 }
 0x2f0   :  { %v337_v42 = vmul.f32 %v307_v40, %v534_v8  ;;  %v338_v43 = vmul.f32 %v307_v40, %v536_v9  ;;  %v335_v44 = vmul.f32 %v303_v41, %v522_v2  ;;  %v336_v45 = vmul.f32 %v303_v41, %v526_v4 }
 0x2f2   :  { %353 = vst [vmem:[#allocation5 + $0x10] sm:$0xff] %v337_v42  ;;  %354 = vst [vmem:[#allocation5 + $0x18] sm:$0xff] %v338_v43 }
 0x2f3   :  { %351 = vst [vmem:[#allocation5] sm:$0xff] %v335_v44  ;;  %352 = vst [vmem:[#allocation5 + $0x8] sm:$0xff] %v336_v45  ;;  %v311_v39 = vpop.permute.xlu1 %310  ;;  %v322_v46 = vpop.permute.xlu0 %321 }
 0x2f4   :  { %v339_v47 = vmul.f32 %v311_v39, %v546_v14  ;;  %v340_v48 = vmul.f32 %v311_v39, %v548_v15  ;;  %v343_v49 = vmul.f32 %v322_v46, %v518_v0  ;;  %v344_v8 = vmul.f32 %v322_v46, %v520_v1 }
 0x2f6   :  { %355 = vst [vmem:[#allocation5 + $0x20] sm:$0xff] %v339_v47  ;;  %356 = vst [vmem:[#allocation5 + $0x28] sm:$0xff] %v340_v48 }
 0x2f7   :  { %359 = vst [vmem:[#allocation5 + $0x40] sm:$0xff] %v343_v49  ;;  %360 = vst [vmem:[#allocation5 + $0x48] sm:$0xff] %v344_v8  ;;  %v315_v2 = vpop.permute.xlu1 %314  ;;  %v330_v4 = vpop.permute.xlu0 %329 }
 0x2f8   :  { %v341_v9 = vmul.f32 %v315_v2, %v558_v20  ;;  %v342_v50 = vmul.f32 %v315_v2, %v560_v21  ;;  %v347_v51 = vmul.f32 %v330_v4, %v542_v12  ;;  %v348_v14 = vmul.f32 %v330_v4, %v544_v13 }
 0x2fa   :  { %357 = vst [vmem:[#allocation5 + $0x30] sm:$0xff] %v341_v9  ;;  %358 = vst [vmem:[#allocation5 + $0x38] sm:$0xff] %v342_v50 }
 0x2fb   :  { %363 = vst [vmem:[#allocation5 + $0x60] sm:$0xff] %v347_v51  ;;  %364 = vst [vmem:[#allocation5 + $0x68] sm:$0xff] %v348_v14  ;;  %v326_v0 = vpop.permute.xlu1 %325 }
 0x2fc   :  { %v345_v1 = vmul.f32 %v326_v0, %v528_v5  ;;  %v346_v15 = vmul.f32 %v326_v0, %v530_v6 }
 0x2fe   :  { %361 = vst [vmem:[#allocation5 + $0x50] sm:$0xff] %v345_v1  ;;  %362 = vst [vmem:[#allocation5 + $0x58] sm:$0xff] %v346_v15 }
 0x2ff   :  { %v334_v20 = vpop.permute.xlu1 %333 }
 0x300   :  { %v349_v21 = vmul.f32 %v334_v20, %v554_v18  ;;  %v350_v12 = vmul.f32 %v334_v20, %v556_v19 }
 0x302   :  { %365 = vst [vmem:[#allocation5 + $0x70] sm:$0xff] %v349_v21  ;;  %366 = vst [vmem:[#allocation5 + $0x78] sm:$0xff] %v350_v12 }
 0x303   :  { %461 = shalt.err (!%p458_p12)
}
 0x304   :  { %s462_s11 = scalar_lea.hbm %s615_s3, 2048 }
 0x305   :  { %p463_p13 = scmp.ne.s32.totalorder %s615_s3, %s462_s11  ;;  %p466_p0 = scmp.lt.u32.totalorder %s462_s11, %s615_s3 }
 0x307   :  { %p468_p1 = pnand %p466_p0, %p463_p13 }
 0x309   :  { %471 = shalt.err (!%p468_p1)
}
 0x30a   :  { %378 = dma.vmem_to_hbm [thread:$0]  %s373_s7, 2048, %s615_s3, [#allocation4], %s477_s22, %s477_s22, %s478_s23  }
 0x30b   :  { %474 = dma.done.wait [#allocation4], 2048  }
 0x30c   :  { %475 = vsyncadd [#allocation4], 4294965248 }
 0x30d   :  { %382 = vsyncpa [#allocation3], 1 }
 0x30e   :  { %383 = vsyncpa [#allocation4], 1 }

</bundles_post_ra>
